<compile_context>
chip_gen: v7x
topology: tpu7x:2x2x1
jax: 0.10.0
libtpu: 0.0.40
codegen_flags: <defaults>
</compile_context>

<pallas_src>
import functools

import jax
import jax.numpy as jnp
from jax.experimental import pallas as pl
from jax.experimental.pallas import tpu as pltpu

BN_EPS = 1e-5
LANE = 128


def _round_up(x, m):
    return ((x + m - 1) // m) * m


def _classifier_kernel(x_ref, *refs, relu_flags):
    """Fused Linear(+folded BN)+ReLU chain on one [tile_m, Cin] row tile.

    refs = (w_0, shift_0, ..., w_{L-1}, shift_{L-1}, o_ref)
      w_l     : [Cpad_{l-1}, Cpad_l]  (transposed, BN-scale folded in, zero-padded, bf16)
      shift_l : [1, Cpad_l] f32       (folded bias + BN shift; zero in padded lanes)
    """
    o_ref = refs[-1]
    param_refs = refs[:-1]
    n_layers = len(param_refs) // 2

    h = x_ref[...]
    for l in range(n_layers):                          # static unroll over layers
        w = param_refs[2 * l][...]
        shift = param_refs[2 * l + 1][...]
        acc = jnp.dot(h.astype(w.dtype), w,            # bf16 MXU, f32 accumulate
                      preferred_element_type=jnp.float32)
        acc = acc + shift                              # folded bias + BN shift (f32)
        if relu_flags[l]:
            # Non-final layer: ReLU then keep the activation in bf16 -- the next
            # matmul casts to bf16 anyway, so this is bit-identical but halves
            # the intermediate's VMEM/vreg footprint.
            h = jnp.maximum(acc, 0.0).astype(w.dtype)
        else:
            h = acc
    o_ref[...] = h.astype(o_ref.dtype)


def _fold_params(mlp_params, final_params, matmul_dtype=jnp.bfloat16):
    """Fold bias + eval-mode BN into the weights / a shift; pad channels to 128 lanes.

    Returns (layers, relu_flags) where layers[l] = (wT, shift),
      wT:    [Cpad_{l-1}, Cpad_l] matmul_dtype   (columns pre-scaled by the BN scale)
      shift: [1, Cpad_l] f32
    Padded output lanes have zero weight columns / zero shift, so they stay exactly 0;
    padded input rows of the next weight are zero, so they contribute nothing.
    """
    fused = []
    relu_flags = []
    for (w, b, gamma, beta, mean, var) in mlp_params:
        scale = gamma / jnp.sqrt(var + BN_EPS)
        shift = scale * (b - mean) + beta
        fused.append((w, scale, shift))
        relu_flags.append(True)
    w_fin, b_fin = final_params
    fused.append((w_fin, jnp.ones_like(b_fin), b_fin))   # final layer: no BN/ReLU
    relu_flags.append(False)

    layers = []
    # First K dim is dim_k unpadded: legal as a full-extent block (PointNet's
    # 128/1024 are already 128-aligned; an odd dim_k would just be slower).
    prev_pad = fused[0][0].shape[1]
    for (w, scale, shift) in fused:
        cout, cin = w.shape
        cpad = _round_up(cout, LANE)
        # Fold the per-channel scale into the weight columns IN F32, then cast.
        w_scaled = jnp.transpose(w).astype(jnp.float32) * scale[None, :].astype(jnp.float32)
        wT = jnp.zeros((prev_pad, cpad), jnp.float32).at[:cin, :cout].set(w_scaled)
        t = jnp.zeros((1, cpad), jnp.float32).at[0, :cout].set(shift)
        layers.append((wT.astype(matmul_dtype), t))
        prev_pad = cpad
    return layers, tuple(relu_flags)


def _pick_tile_m(M, max_tile_m):
    """Row tile: large (multiple of 256) to amortize per-step overhead, but at
    least 2 grid steps for non-tiny batches so v7x's two TensorCores both work."""
    max_tile_m = max(256, _round_up(max_tile_m, 256))
    if M <= 16:
        return M                      # tiny batch: single full-extent block
    if M > 2 * max_tile_m:
        return max_tile_m
    granule = 8 if M < 512 else 256   # sublane-aligned; MXU-pass aligned when large
    half = _round_up(pl.cdiv(M, 2), granule)
    return min(half, max_tile_m)


def _vmem_limit_bytes(tile_m, x_itemsize, cin, layers, cout_pad, out_itemsize):
    """Right-sized VMEM budget computed from the actual buffers (with headroom)."""
    est = 2 * tile_m * cin * x_itemsize                 # x double-buffer
    est += 2 * tile_m * cout_pad * out_itemsize         # out double-buffer
    param_bytes = 0
    for (w, t) in layers:
        param_bytes += int(w.size) * w.dtype.itemsize + int(t.size) * 4
    est += 2 * param_bytes                              # param (double-)buffers
    widest = max(int(w.shape[1]) for (w, _) in layers)
    est += 2 * tile_m * widest * (4 + 2)                # f32 dot result + bf16 act
    return int(min(64 * 1024 * 1024, max(2 * est, 16 * 1024 * 1024)))


def _fused_mlp_2d(x2d, layers, relu_flags, *, max_tile_m=1024, out_dtype=jnp.float32):
    """x2d: [M, Cin] -> [M, Cpad_last] via a single fused pallas_call."""
    M, Cin = x2d.shape
    Cout_pad = layers[-1][0].shape[1]

    tile_m = _pick_tile_m(M, max_tile_m)
    n_tiles = pl.cdiv(M, tile_m)

    in_specs = [pl.BlockSpec((tile_m, Cin), lambda i: (i, 0))]
    flat_args = [x2d]
    for (w, t) in layers:
        # Constant index_map: parameter blocks never change across row tiles, so
        # Pallas fetches them once and keeps them resident.
        in_specs.append(pl.BlockSpec(w.shape, lambda i: (0, 0)))
        in_specs.append(pl.BlockSpec(t.shape, lambda i: (0, 0)))
        flat_args += [w, t]

    flops = 0
    param_bytes = 0
    for (w, t) in layers:
        flops += 2 * M * int(w.shape[0]) * int(w.shape[1])
        param_bytes += int(w.size) * w.dtype.itemsize + int(t.size) * 4
    out_itemsize = jnp.dtype(out_dtype).itemsize
    cost = pl.CostEstimate(
        flops=int(flops),
        transcendentals=0,
        bytes_accessed=int(x2d.size) * x2d.dtype.itemsize
        + M * Cout_pad * out_itemsize + param_bytes,
    )

    kernel = functools.partial(_classifier_kernel, relu_flags=relu_flags)
    out = pl.pallas_call(
        kernel,
        out_shape=jax.ShapeDtypeStruct((M, Cout_pad), out_dtype),
        grid_spec=pltpu.PrefetchScalarGridSpec(
            num_scalar_prefetch=0,
            grid=(n_tiles,),
            in_specs=in_specs,
            out_specs=pl.BlockSpec((tile_m, Cout_pad), lambda i: (i, 0)),
        ),
        compiler_params=pltpu.CompilerParams(
            dimension_semantics=("parallel",),
            vmem_limit_bytes=_vmem_limit_bytes(
                tile_m, x2d.dtype.itemsize, Cin, layers, Cout_pad, out_itemsize),
        ),
        cost_estimate=cost,
    )(*flat_args)
    return out


def pointnet_classifier_forward(feat, mlp_params, final_params, *,
                                max_tile_m=1024, matmul_dtype=jnp.bfloat16,
                                out_dtype=jnp.float32):
    """PointNet_classifier.classifier forward: feat [B, dim_k] -> logits [B, num_c].

    feat may be f32 or bf16; it is streamed as-is (no wrapper cast / pad pass).
    Logits default to f32 (kept for the downstream log_softmax/nll_loss)."""
    layers, relu_flags = _fold_params(mlp_params, final_params, matmul_dtype)
    num_c = final_params[0].shape[0]
    out = _fused_mlp_2d(feat, layers, relu_flags,
                        max_tile_m=max_tile_m, out_dtype=out_dtype)
    return out[:, :num_c]


def classifier_reference(feat, mlp_params, final_params, *, matmul_dtype=None):
    """Pure-JAX reference mirroring the PyTorch eval()-mode classifier forward.

    If matmul_dtype is given, matmul operands are rounded to it first (matching
    the kernel's MXU arithmetic) while accumulating in f32.
    """
    def mm(h, wT):
        if matmul_dtype is not None:
            h = h.astype(matmul_dtype).astype(jnp.float32)
            wT = wT.astype(matmul_dtype).astype(jnp.float32)
        return h @ wT

    h = feat.astype(jnp.float32)
    for (w, b, gamma, beta, mean, var) in mlp_params:
        h = mm(h, jnp.transpose(w)) + b
        h = gamma * (h - mean) / jnp.sqrt(var + BN_EPS) + beta
        h = jnp.maximum(h, 0.0)
    w, b = final_params
    return mm(h, jnp.transpose(w)) + b


def init_params(key, dim_k, num_c):
    """Deterministic synthetic parameters with PyTorch-module shapes."""
    mlp_params = []
    last = dim_k
    for outp in (512, 256):                      # hardcoded in PointNet_classifier
        key, kw, kb, kg, kbeta, km, kv = jax.random.split(key, 7)
        bound = 1.0 / float(last) ** 0.5
        w = jax.random.uniform(kw, (outp, last), jnp.float32, -bound, bound)
        b = jax.random.uniform(kb, (outp,), jnp.float32, -bound, bound)
        gamma = jax.random.uniform(kg, (outp,), jnp.float32, 0.5, 1.5)
        beta = jax.random.uniform(kbeta, (outp,), jnp.float32, -0.1, 0.1)
        mean = jax.random.uniform(km, (outp,), jnp.float32, -0.1, 0.1)
        var = jax.random.uniform(kv, (outp,), jnp.float32, 0.5, 1.5)
        mlp_params.append((w, b, gamma, beta, mean, var))
        last = outp
    key, kw, kb = jax.random.split(key, 3)
    bound = 1.0 / float(last) ** 0.5
    w = jax.random.uniform(kw, (num_c, last), jnp.float32, -bound, bound)
    b = jax.random.uniform(kb, (num_c,), jnp.float32, -bound, bound)
    return mlp_params, (w, b)


if __name__ == "__main__":
    key = jax.random.PRNGKey(0)
    dim_k, num_c = 128, 16            # PointNet_classifier(num_c=16, ptfeat, dim_k=128)
    kx, kp, kx2 = jax.random.split(key, 3)
    mlp_params, final_params = init_params(kp, dim_k, num_c)

    # feat stands in for self.features(points) (external ptfeat module), emitted in bf16.
    B = 4
    feat = jax.random.normal(kx, (B, dim_k), jnp.float32).astype(jnp.bfloat16)
    out = jax.block_until_ready(
        pointnet_classifier_forward(feat, mlp_params, final_params))

    ref_bf16 = classifier_reference(feat, mlp_params, final_params,
                                    matmul_dtype=jnp.bfloat16)
    ref_f32 = classifier_reference(feat, mlp_params, final_params)
    assert out.shape == (B, num_c), out.shape
    assert out.dtype == jnp.float32, out.dtype
    assert jnp.allclose(out, ref_bf16, rtol=2e-2, atol=2e-2), float(
        jnp.max(jnp.abs(out - ref_bf16)))
    assert jnp.allclose(out, ref_f32, rtol=5e-2, atol=5e-2), float(
        jnp.max(jnp.abs(out - ref_f32)))

    # Second shape exercises the multi-tile path (>=2 grid steps + ragged tail).
    B2 = 300
    feat2 = jax.random.normal(kx2, (B2, dim_k), jnp.float32).astype(jnp.bfloat16)
    out2 = jax.block_until_ready(
        pointnet_classifier_forward(feat2, mlp_params, final_params))
    ref2 = classifier_reference(feat2, mlp_params, final_params,
                                matmul_dtype=jnp.bfloat16)
    assert out2.shape == (B2, num_c), out2.shape
    assert jnp.allclose(out2, ref2, rtol=2e-2, atol=2e-2), float(
        jnp.max(jnp.abs(out2 - ref2)))

    print("KERNEL_OK")
</pallas_src>

<mosaic_0001>
module attributes {stable_mosaic.version = 11 : i64} {
  func.func @_classifier_kernel(%arg0: i32, %arg1: memref<4x128xbf16, #tpu.memory_space<vmem>>, %arg2: memref<128x512xbf16, #tpu.memory_space<vmem>>, %arg3: memref<1x512xf32, #tpu.memory_space<vmem>>, %arg4: memref<512x256xbf16, #tpu.memory_space<vmem>>, %arg5: memref<1x256xf32, #tpu.memory_space<vmem>>, %arg6: memref<256x128xbf16, #tpu.memory_space<vmem>>, %arg7: memref<1x128xf32, #tpu.memory_space<vmem>>, %arg8: memref<4x128xf32, #tpu.memory_space<vmem>>) attributes {dimension_semantics = [#tpu.dimension_semantics<parallel>], iteration_bounds = array<i64: 1>, scalar_prefetch = 0 : i64, scratch_operands = 0 : i64, tpu.core_type = #tpu.core_type<tc>, window_params = [{transform_indices = @transform_0, window_bounds = array<i64: 4, 128>}, {pipeline_mode = #tpu.pipeline_mode<synchronous>, transform_indices = @transform_1, window_bounds = array<i64: 128, 512>}, {pipeline_mode = #tpu.pipeline_mode<synchronous>, transform_indices = @transform_2, window_bounds = array<i64: 1, 512>}, {pipeline_mode = #tpu.pipeline_mode<synchronous>, transform_indices = @transform_3, window_bounds = array<i64: 512, 256>}, {pipeline_mode = #tpu.pipeline_mode<synchronous>, transform_indices = @transform_4, window_bounds = array<i64: 1, 256>}, {pipeline_mode = #tpu.pipeline_mode<synchronous>, transform_indices = @transform_5, window_bounds = array<i64: 256, 128>}, {pipeline_mode = #tpu.pipeline_mode<synchronous>, transform_indices = @transform_6, window_bounds = array<i64: 1, 128>}, {transform_indices = @transform_7, window_bounds = array<i64: 4, 128>}]} {
    %c0 = arith.constant 0 : index
    %c0_0 = arith.constant 0 : index
    %0 = vector.load %arg1[%c0, %c0_0] : memref<4x128xbf16, #tpu.memory_space<vmem>>, vector<4x128xbf16>
    %c0_1 = arith.constant 0 : index
    %c0_2 = arith.constant 0 : index
    %1 = vector.load %arg2[%c0_1, %c0_2] : memref<128x512xbf16, #tpu.memory_space<vmem>>, vector<128x512xbf16>
    %c0_3 = arith.constant 0 : index
    %c0_4 = arith.constant 0 : index
    %2 = vector.load %arg3[%c0_3, %c0_4] : memref<1x512xf32, #tpu.memory_space<vmem>>, vector<1x512xf32>
    %cst = arith.constant dense<0.000000e+00> : vector<4x512xf32>
    %3 = tpu.matmul %0, %1, %cst {dimension_numbers = #tpu.dot_dimension_numbers<[1], [0], [0], [1], [0, 0, 1, 1], [], []>} : vector<4x128xbf16>, vector<128x512xbf16>, vector<4x512xf32> -> vector<4x512xf32>
    %4 = vector.broadcast %2 : vector<1x512xf32> to vector<4x512xf32>
    %5 = arith.addf %3, %4 : vector<4x512xf32>
    %cst_5 = arith.constant 0.000000e+00 : f32
    %6 = vector.broadcast %cst_5 : f32 to vector<4x512xf32>
    %7 = arith.maximumf %5, %6 : vector<4x512xf32>
    %8 = arith.truncf %7 : vector<4x512xf32> to vector<4x512xbf16>
    %c0_6 = arith.constant 0 : index
    %c0_7 = arith.constant 0 : index
    %9 = vector.load %arg4[%c0_6, %c0_7] : memref<512x256xbf16, #tpu.memory_space<vmem>>, vector<512x256xbf16>
    %c0_8 = arith.constant 0 : index
    %c0_9 = arith.constant 0 : index
    %10 = vector.load %arg5[%c0_8, %c0_9] : memref<1x256xf32, #tpu.memory_space<vmem>>, vector<1x256xf32>
    %cst_10 = arith.constant dense<0.000000e+00> : vector<4x256xf32>
    %11 = tpu.matmul %8, %9, %cst_10 {dimension_numbers = #tpu.dot_dimension_numbers<[1], [0], [0], [1], [0, 0, 1, 1], [], []>} : vector<4x512xbf16>, vector<512x256xbf16>, vector<4x256xf32> -> vector<4x256xf32>
    %12 = vector.broadcast %10 : vector<1x256xf32> to vector<4x256xf32>
    %13 = arith.addf %11, %12 : vector<4x256xf32>
    %cst_11 = arith.constant 0.000000e+00 : f32
    %14 = vector.broadcast %cst_11 : f32 to vector<4x256xf32>
    %15 = arith.maximumf %13, %14 : vector<4x256xf32>
    %16 = arith.truncf %15 : vector<4x256xf32> to vector<4x256xbf16>
    %c0_12 = arith.constant 0 : index
    %c0_13 = arith.constant 0 : index
    %17 = vector.load %arg6[%c0_12, %c0_13] : memref<256x128xbf16, #tpu.memory_space<vmem>>, vector<256x128xbf16>
    %c0_14 = arith.constant 0 : index
    %c0_15 = arith.constant 0 : index
    %18 = vector.load %arg7[%c0_14, %c0_15] : memref<1x128xf32, #tpu.memory_space<vmem>>, vector<1x128xf32>
    %cst_16 = arith.constant dense<0.000000e+00> : vector<4x128xf32>
    %19 = tpu.matmul %16, %17, %cst_16 {dimension_numbers = #tpu.dot_dimension_numbers<[1], [0], [0], [1], [0, 0, 1, 1], [], []>} : vector<4x256xbf16>, vector<256x128xbf16>, vector<4x128xf32> -> vector<4x128xf32>
    %20 = vector.broadcast %18 : vector<1x128xf32> to vector<4x128xf32>
    %21 = arith.addf %19, %20 : vector<4x128xf32>
    %c0_17 = arith.constant 0 : index
    %c0_18 = arith.constant 0 : index
    %22 = vector.load %arg8[%c0_17, %c0_18] : memref<4x128xf32, #tpu.memory_space<vmem>>, vector<4x128xf32>
    tpu.vector_store %arg8[%c0_17, %c0_18], %21 {strides = array<i32>} : memref<4x128xf32, #tpu.memory_space<vmem>>, vector<4x128xf32>,
    return
  }
  func.func @transform_0(%arg0: i32) -> (i32, i32) {
    %c0_i32 = arith.constant 0 : i32
    %c0_i32_0 = arith.constant 0 : i32
    return %arg0, %c0_i32 : i32, i32
  }
  func.func @transform_1(%arg0: i32) -> (i32, i32) {
    %c0_i32 = arith.constant 0 : i32
    %c0_i32_0 = arith.constant 0 : i32
    %c0_i32_1 = arith.constant 0 : i32
    return %c0_i32, %c0_i32_0 : i32, i32
  }
  func.func @transform_2(%arg0: i32) -> (i32, i32) {
    %c0_i32 = arith.constant 0 : i32
    %c0_i32_0 = arith.constant 0 : i32
    %c0_i32_1 = arith.constant 0 : i32
    return %c0_i32, %c0_i32_0 : i32, i32
  }
  func.func @transform_3(%arg0: i32) -> (i32, i32) {
    %c0_i32 = arith.constant 0 : i32
    %c0_i32_0 = arith.constant 0 : i32
    %c0_i32_1 = arith.constant 0 : i32
    return %c0_i32, %c0_i32_0 : i32, i32
  }
  func.func @transform_4(%arg0: i32) -> (i32, i32) {
    %c0_i32 = arith.constant 0 : i32
    %c0_i32_0 = arith.constant 0 : i32
    %c0_i32_1 = arith.constant 0 : i32
    return %c0_i32, %c0_i32_0 : i32, i32
  }
  func.func @transform_5(%arg0: i32) -> (i32, i32) {
    %c0_i32 = arith.constant 0 : i32
    %c0_i32_0 = arith.constant 0 : i32
    %c0_i32_1 = arith.constant 0 : i32
    return %c0_i32, %c0_i32_0 : i32, i32
  }
  func.func @transform_6(%arg0: i32) -> (i32, i32) {
    %c0_i32 = arith.constant 0 : i32
    %c0_i32_0 = arith.constant 0 : i32
    %c0_i32_1 = arith.constant 0 : i32
    return %c0_i32, %c0_i32_0 : i32, i32
  }
  func.func @transform_7(%arg0: i32) -> (i32, i32) {
    %c0_i32 = arith.constant 0 : i32
    %c0_i32_0 = arith.constant 0 : i32
    return %arg0, %c0_i32 : i32, i32
  }
}

</mosaic_0001>

<bundles_post_ra>
// kernel: tpu_custom_call.1
= control target key start
LH: loop header
LB: loop body
LE: loop exit
PB: predicated region body
PF: predicated region fallthrough
CT: control target
= control target key end

     0   :  { %12 = vsyncpa [#allocation3], 0  ;;  %s1637_s0 = inlined_call_operand.hbm [shape: bf16[4,128], index: 0, kind: input, shape index: {}]   ;;  %s1638_s1 = inlined_call_operand.hbm [shape: bf16[128,512], index: 1, kind: input, shape index: {}]   ;;  %s1639_s2 = inlined_call_operand.vmem [shape: f32[1,512], index: 2, kind: input, shape index: {}]   ;;  %s1640_s3 = inlined_call_operand.hbm [shape: bf16[512,256], index: 3, kind: input, shape index: {}]   ;;  %s1641_s4 = inlined_call_operand.vmem [shape: f32[1,256], index: 4, kind: input, shape index: {}]   ;;  %s1642_s5 = inlined_call_operand.hbm [shape: bf16[256,128], index: 5, kind: input, shape index: {}]   ;;  %s1643_s6 = inlined_call_operand.vmem [shape: f32[1,128], index: 6, kind: input, shape index: {}]   ;;  %s1644_s7 = inlined_call_operand.hbm [shape: f32[4,128], index: 7, kind: output, shape index: {}]  }
   0x1   :  { %13 = vsyncpa [#allocation6], 0 }
   0x2   :  { %14 = vsyncpa [#allocation9], 0 }
   0x3   :  { %15 = vsyncpa [#allocation4], 0  ;;  %s1492_s24 = smov [#allocation5]   ;;  %s1374_s28 = scalar_lea.hbm %s1638_s1, 4096 }
   0x4   :  { %s31_s25 = sshll.u32 %s1492_s24, 4  ;;  %p1375_p0 = scmp.ne.s32.totalorder %s1638_s1, %s1374_s28  ;;  %s32_s25 = int_to_ptr.vmem [resolvable:$true] %s31_s25 }
   0x5   :  { %p1378_p1 = scmp.lt.u32.totalorder %s1374_s28, %s1638_s1 }
   0x7   :  { %p1380_p2 = pnand %p1378_p1, %p1375_p0 }
   0x9   :  { %1383 = shalt.err (!%p1380_p2)
}
   0xa   :  { %s1384_s10 = scalar_lea.vmem %s32_s25, 4096  ;;  %p1389_p4 = scmp.lt.s32.totalorder %s32_s25, %s32_s25 }
   0xb   :  { %p1385_p3 = scmp.ne.s32.totalorder %s32_s25, %s1384_s10  ;;  %p1390_p5 = scmp.lt.s32.totalorder %s1384_s10, %s1384_s10 }
   0xd   :  { %p1391_p6 = por %p1390_p5, %p1389_p4 }
   0xf   :  { %p1392_p7 = pnand %p1391_p6, %p1385_p3 }
  0x11   :  { %1395 = shalt.err (!%p1392_p7)
}
  0x12   :  { %s1493_s11 = smov 256   ;;  %s1494_s12 = smov 16  }
  0x13   :  { %37 = dma.hbm_to_vmem [thread:$0]  %s1638_s1, 4096, %s32_s25, [#allocation6], %s1493_s11, %s1493_s11, %s1494_s12  }
  0x14   :  { %s1495_s15 = smov [#allocation2]   ;;  %s1496_s17 = smov [#allocation7]  }
  0x15   :  { %s22_s16 = sshll.u32 %s1495_s15, 4  ;;  %s45_s18 = sshll.u32 %s1496_s17, 4  ;;  %s23_s16 = int_to_ptr.vmem [resolvable:$true] %s22_s16  ;;  %s46_s18 = int_to_ptr.vmem [resolvable:$true] %s45_s18 }
  0x16   :  { %s1396_s21 = scalar_lea.hbm %s1637_s0, 32 }
  0x17   :  { %p1397_p8 = scmp.ne.s32.totalorder %s1637_s0, %s1396_s21  ;;  %p1400_p9 = scmp.lt.u32.totalorder %s1396_s21, %s1637_s0 }
  0x19   :  { %p1402_p10 = pnand %p1400_p9, %p1397_p8 }
  0x1b   :  { %1405 = shalt.err (!%p1402_p10)
}
  0x1c   :  { %s1406_s1 = scalar_lea.vmem %s23_s16, 32  ;;  %p1411_p12 = scmp.lt.s32.totalorder %s23_s16, %s23_s16 }
  0x1d   :  { %p1407_p11 = scmp.ne.s32.totalorder %s23_s16, %s1406_s1  ;;  %p1412_p13 = scmp.lt.s32.totalorder %s1406_s1, %s1406_s1 }
  0x1f   :  { %p1413_p0 = por %p1412_p13, %p1411_p12 }
  0x21   :  { %p1414_p1 = pnand %p1413_p0, %p1407_p11 }
  0x23   :  { %1417 = shalt.err (!%p1414_p1)
}
  0x24   :  { %25 = dma.hbm_to_vmem [thread:$0]  %s1637_s0, 32, %s23_s16, [#allocation3]  }
  0x25   :  { %s1418_s30 = scalar_lea.hbm %s1640_s3, 8192 }
  0x26   :  { %p1419_p2 = scmp.ne.s32.totalorder %s1640_s3, %s1418_s30  ;;  %p1422_p3 = scmp.lt.u32.totalorder %s1418_s30, %s1640_s3 }
  0x28   :  { %p1424_p4 = pnand %p1422_p3, %p1419_p2 }
  0x2a   :  { %1427 = shalt.err (!%p1424_p4)
}
  0x2b   :  { %s1428_s12 = scalar_lea.vmem %s46_s18, 8192  ;;  %p1433_p6 = scmp.lt.s32.totalorder %s46_s18, %s46_s18 }
  0x2c   :  { %p1429_p5 = scmp.ne.s32.totalorder %s46_s18, %s1428_s12  ;;  %p1434_p7 = scmp.lt.s32.totalorder %s1428_s12, %s1428_s12 }
  0x2e   :  { %p1435_p8 = por %p1434_p7, %p1433_p6 }
  0x30   :  { %p1436_p9 = pnand %p1435_p8, %p1429_p5 }
  0x32   :  { %1439 = shalt.err (!%p1436_p9)
}
  0x33   :  { %s1497_s0 = smov 128   ;;  %s1498_s13 = smov 8  }
  0x34   :  { %51 = dma.hbm_to_vmem [thread:$0]  %s1640_s3, 8192, %s46_s18, [#allocation6], %s1497_s0, %s1497_s0, %s1498_s13  }
  0x35   :  { %s1499_s16 = smov [#allocation8]   ;;  %s1440_s21 = scalar_lea.hbm %s1642_s5, 2048 }
  0x36   :  { %s59_s17 = sshll.u32 %s1499_s16, 4  ;;  %p1441_p10 = scmp.ne.s32.totalorder %s1642_s5, %s1440_s21  ;;  %s60_s17 = int_to_ptr.vmem [resolvable:$true] %s59_s17 }
  0x37   :  { %p1444_p11 = scmp.lt.u32.totalorder %s1440_s21, %s1642_s5 }
  0x39   :  { %p1446_p12 = pnand %p1444_p11, %p1441_p10 }
  0x3b   :  { %1449 = shalt.err (!%p1446_p12)
}
  0x3c   :  { %s1450_s1 = scalar_lea.vmem %s60_s17, 2048  ;;  %p1455_p0 = scmp.lt.s32.totalorder %s60_s17, %s60_s17 }
  0x3d   :  { %p1451_p13 = scmp.ne.s32.totalorder %s60_s17, %s1450_s1  ;;  %p1456_p1 = scmp.lt.s32.totalorder %s1450_s1, %s1450_s1 }
  0x3f   :  { %p1457_p2 = por %p1456_p1, %p1455_p0 }
  0x41   :  { %p1458_p3 = pnand %p1457_p2, %p1451_p13 }
  0x43   :  { %1461 = shalt.err (!%p1458_p3)
}
  0x44   :  { %s1500_s3 = smov 64   ;;  %s1501_s18 = smov 4  }
  0x45   :  { %65 = dma.hbm_to_vmem [thread:$0]  %s1642_s5, 2048, %s60_s17, [#allocation9], %s1500_s3, %s1500_s3, %s1501_s18  }
  0x46   :  { %1484 = dma.done.wait [#allocation3], 32  }
  0x47   :  { %1485 = vsyncadd [#allocation3], 4294967264 }
  0x48   :  { %1486 = dma.done.wait [#allocation6], 12288  }
  0x49   :  { %1487 = vsyncadd [#allocation6], 4294955008 }
  0x4a   :  { %1488 = dma.done.wait [#allocation9], 2048  }
  0x4b   :  { %1489 = vsyncadd [#allocation9], 4294965248  ;;  %v1502_v0 = vmov 0   ;;  %v1214_v1 = vld [vmem:[#allocation5 + $0x4] ss:$16 sps:$4 sm:$0xff]   ;;  %s1503_s8 = smov [#allocation10]  }
  0x4c   :  { %328 = vmatprep.mubr.bf16.mxu1 %v1502_v0  ;;  %v1216_v2 = vld [vmem:[#allocation5] ss:$16 sps:$4 sm:$0xff]   ;;  %296 = vmatprep.subr.bf16.mxu1 %v1214_v1  ;;  %v1217_v3 = vld [vmem:[#allocation5 + $0x24] ss:$16 sps:$4 sm:$0xff]   ;;  %v1240_v22 = vld [vmem:[#allocation5 + $0xc] ss:$16 sps:$4 sm:$0xff]  }
  0x4d   :  { %297 = vmatpush1.bf16.msra.mxu1 %v1216_v2  ;;  %v1219_v4 = vld [vmem:[#allocation5 + $0x20] ss:$16 sps:$4 sm:$0xff]   ;;  %v1220_v5 = vld [vmem:[#allocation5 + $0x44] ss:$16 sps:$4 sm:$0xff]   ;;  %v1592_v24 = vld [vmem:[#allocation2] sm:$0x3] }
  0x4e   :  { %298 = vmatprep.subr.bf16.mxu1 %v1217_v3  ;;  %v1222_v6 = vld [vmem:[#allocation5 + $0x40] ss:$16 sps:$4 sm:$0xff]   ;;  %v1223_v7 = vld [vmem:[#allocation5 + $0x64] ss:$16 sps:$4 sm:$0xff]   ;;  %v1238_v26 = vld [vmem:[#allocation5 + $0x8] ss:$16 sps:$4 sm:$0xff]  }
  0x4f   :  { %v1225_v8 = vld [vmem:[#allocation5 + $0x60] ss:$16 sps:$4 sm:$0xff]   ;;  %v1226_v9 = vld [vmem:[#allocation5 + $0x84] ss:$16 sps:$4 sm:$0xff]   ;;  %v1243_v27 = vld [vmem:[#allocation5 + $0x2c] ss:$16 sps:$4 sm:$0xff]  }
  0x50   :  { %v1228_v10 = vld [vmem:[#allocation5 + $0x80] ss:$16 sps:$4 sm:$0xff]   ;;  %v1229_v11 = vld [vmem:[#allocation5 + $0xa4] ss:$16 sps:$4 sm:$0xff]   ;;  %v1241_v30 = vld [vmem:[#allocation5 + $0x28] ss:$16 sps:$4 sm:$0xff]  }
  0x51   :  { %299 = vmatpush1.bf16.msra.mxu1 %v1219_v4  ;;  %v1231_v12 = vld [vmem:[#allocation5 + $0xa0] ss:$16 sps:$4 sm:$0xff]   ;;  %v1232_v13 = vld [vmem:[#allocation5 + $0xc4] ss:$16 sps:$4 sm:$0xff]   ;;  %v1246_v31 = vld [vmem:[#allocation5 + $0x4c] ss:$16 sps:$4 sm:$0xff]  }
  0x52   :  { %300 = vmatprep.subr.bf16.mxu1 %v1220_v5  ;;  %v1234_v14 = vld [vmem:[#allocation5 + $0xc0] ss:$16 sps:$4 sm:$0xff]   ;;  %v1262_v15 = vld [vmem:[#allocation7 + $0x4] ss:$8 sps:$4 sm:$0xff]   ;;  %v1265_v17 = vld [vmem:[#allocation7 + $0x14] ss:$8 sps:$4 sm:$0xff]  }
  0x53   :  { %v1264_v16 = vld [vmem:[#allocation7] ss:$8 sps:$4 sm:$0xff]   ;;  %v1235_v18 = vld [vmem:[#allocation5 + $0xe4] ss:$16 sps:$4 sm:$0xff]   ;;  %782 = vmatprep.subr.bf16.mxu0 %v1262_v15  ;;  %v1267_v19 = vld [vmem:[#allocation7 + $0x10] ss:$8 sps:$4 sm:$0xff]   ;;  %v116_v15 = vlaneseq }
  0x54   :  { %783 = vmatpush1.bf16.msra.mxu0 %v1264_v16  ;;  %v1268_v20 = vld [vmem:[#allocation7 + $0x24] ss:$8 sps:$4 sm:$0xff]   ;;  %v1237_v21 = vld [vmem:[#allocation5 + $0xe0] ss:$16 sps:$4 sm:$0xff]   ;;  %v1271_v25 = vld [vmem:[#allocation7 + $0x34] ss:$8 sps:$4 sm:$0xff]  }
  0x55   :  { %301 = vmatpush1.bf16.msra.mxu1 %v1222_v6  ;;  %784 = vmatprep.subr.bf16.mxu0 %v1265_v17  ;;  %v1270_v23 = vld [vmem:[#allocation7 + $0x20] ss:$8 sps:$4 sm:$0xff]   ;;  %v1273_v28 = vld [vmem:[#allocation7 + $0x30] ss:$8 sps:$4 sm:$0xff]   ;;  %v1274_v29 = vld [vmem:[#allocation7 + $0x44] ss:$8 sps:$4 sm:$0xff]  }
  0x56   :  { %302 = vmatprep.subr.bf16.mxu1 %v1223_v7  ;;  %v1276_v32 = vld [vmem:[#allocation7 + $0x40] ss:$8 sps:$4 sm:$0xff]   ;;  %v1277_v34 = vld [vmem:[#allocation7 + $0x54] ss:$8 sps:$4 sm:$0xff]   ;;  %v1279_v36 = vld [vmem:[#allocation7 + $0x50] ss:$8 sps:$4 sm:$0xff]  }
  0x57   :  { %v1244_v33 = vld [vmem:[#allocation5 + $0x48] ss:$16 sps:$4 sm:$0xff]   ;;  %v1249_v35 = vld [vmem:[#allocation5 + $0x6c] ss:$16 sps:$4 sm:$0xff]   ;;  %v1358_v3 = vld [vmem:[#allocation8 + $0x40] sm:$0xff]   ;;  %v1596_v16 = vshrl.u32 %v116_v15, 7 }
  0x58   :  { %785 = vmatpush1.bf16.msra.mxu0 %v1267_v19  ;;  %v1280_v37 = vld [vmem:[#allocation7 + $0x64] ss:$8 sps:$4 sm:$0xff]   ;;  %v1247_v38 = vld [vmem:[#allocation5 + $0x68] ss:$16 sps:$4 sm:$0xff]   ;;  %v1283_v41 = vld [vmem:[#allocation7 + $0x74] ss:$8 sps:$4 sm:$0xff]  }
  0x59   :  { %303 = vmatpush1.bf16.msra.mxu1 %v1225_v8  ;;  %786 = vmatprep.subr.bf16.mxu0 %v1268_v20  ;;  %v1252_v39 = vld [vmem:[#allocation5 + $0x8c] ss:$16 sps:$4 sm:$0xff]   ;;  %v1282_v40 = vld [vmem:[#allocation7 + $0x60] ss:$8 sps:$4 sm:$0xff]   ;;  %v1285_v44 = vld [vmem:[#allocation7 + $0x70] ss:$8 sps:$4 sm:$0xff]  }
  0x5a   :  { %304 = vmatprep.subr.bf16.mxu1 %v1226_v9  ;;  %v1250_v42 = vld [vmem:[#allocation5 + $0x88] ss:$16 sps:$4 sm:$0xff]   ;;  %v1255_v43 = vld [vmem:[#allocation5 + $0xac] ss:$16 sps:$4 sm:$0xff]   ;;  %v1359_v4 = vld [vmem:[#allocation8] sm:$0xff]   ;;  %v118_v17 = vsub.s32 0, %v1596_v16 }
  0x5b   :  { %v1286_v45 = vld [vmem:[#allocation7 + $0x84] ss:$8 sps:$4 sm:$0xff]   ;;  %v1253_v46 = vld [vmem:[#allocation5 + $0xa8] ss:$16 sps:$4 sm:$0xff]   ;;  %v1289_v49 = vld [vmem:[#allocation7 + $0x94] ss:$8 sps:$4 sm:$0xff]  }
  0x5c   :  { %787 = vmatpush1.bf16.msra.mxu0 %v1270_v23  ;;  %v1258_v47 = vld [vmem:[#allocation5 + $0xcc] ss:$16 sps:$4 sm:$0xff]   ;;  %v1288_v48 = vld [vmem:[#allocation7 + $0x80] ss:$8 sps:$4 sm:$0xff]   ;;  %v1291_v52 = vld [vmem:[#allocation7 + $0x90] ss:$8 sps:$4 sm:$0xff]  }
  0x5d   :  { %305 = vmatpush1.bf16.msra.mxu1 %v1228_v10  ;;  %788 = vmatprep.subr.bf16.mxu0 %v1271_v25  ;;  %v1256_v50 = vld [vmem:[#allocation5 + $0xc8] ss:$16 sps:$4 sm:$0xff]   ;;  %v1261_v51 = vld [vmem:[#allocation5 + $0xec] ss:$16 sps:$4 sm:$0xff]   ;;  %v1362_v7 = vld [vmem:[#allocation8 + $0x50] sm:$0xff]   ;;  %v122_v19 = vsub.s32 1, %v1596_v16 }
  0x5e   :  { %306 = vmatprep.subr.bf16.mxu1 %v1229_v11  ;;  %v1292_v53 = vld [vmem:[#allocation7 + $0xa4] ss:$8 sps:$4 sm:$0xff]   ;;  %v1259_v54 = vld [vmem:[#allocation5 + $0xe8] ss:$16 sps:$4 sm:$0xff]   ;;  %v1295_v56 = vld [vmem:[#allocation7 + $0xb4] ss:$8 sps:$4 sm:$0xff]  }
  0x5f   :  { %v1294_v55 = vld [vmem:[#allocation7 + $0xa0] ss:$8 sps:$4 sm:$0xff]   ;;  %v1297_v57 = vld [vmem:[#allocation7 + $0xb0] ss:$8 sps:$4 sm:$0xff]   ;;  %v1298_v58 = vld [vmem:[#allocation7 + $0xc4] ss:$8 sps:$4 sm:$0xff]  }
  0x60   :  { %789 = vmatpush1.bf16.msra.mxu0 %v1273_v28  ;;  %v1300_v59 = vld [vmem:[#allocation7 + $0xc0] ss:$8 sps:$4 sm:$0xff]   ;;  %v1301_v60 = vld [vmem:[#allocation7 + $0xd4] ss:$8 sps:$4 sm:$0xff]   ;;  %v1303_v61 = vld [vmem:[#allocation7 + $0xd0] ss:$8 sps:$4 sm:$0xff]  }
  0x61   :  { %307 = vmatpush1.bf16.msra.mxu1 %v1231_v12  ;;  %790 = vmatprep.subr.bf16.mxu0 %v1274_v29  ;;  %v1304_v62 = vld [vmem:[#allocation7 + $0xe4] ss:$8 sps:$4 sm:$0xff]   ;;  %v1306_v63 = vld [vmem:[#allocation7 + $0xe0] ss:$8 sps:$4 sm:$0xff]   ;;  %v1309_v1 = vld [vmem:[#allocation7 + $0xf0] ss:$8 sps:$4 sm:$0xff]  }
  0x62   :  { %308 = vmatprep.subr.bf16.mxu1 %v1232_v13  ;;  %v1312_v2 = vld [vmem:[#allocation7 + $0x104] ss:$8 sps:$4 sm:$0xff]   ;;  %v1363_v8 = vld [vmem:[#allocation8 + $0x10] sm:$0xff]   ;;  %v1364_v9 = vld [vmem:[#allocation8 + $0x58] sm:$0xff]   ;;  %s1050_s9 = sshll.u32 %s1503_s8, 4  ;;  %s1051_s9 = int_to_ptr.vmem [resolvable:$true] %s1050_s9 }
  0x63   :  { %v1360_v5 = vld [vmem:[#allocation8 + $0x48] sm:$0xff]   ;;  %v1365_v10 = vld [vmem:[#allocation8 + $0x18] sm:$0xff]   ;;  %v1366_v11 = vld [vmem:[#allocation8 + $0x60] sm:$0xff]   ;;  %s1462_s10 = scalar_lea.vmem %s1051_s9, 64  ;;  %p1467_p5 = scmp.lt.s32.totalorder %s1051_s9, %s1051_s9 }
  0x64   :  { %791 = vmatpush1.bf16.msra.mxu0 %v1276_v32  ;;  %v1361_v6 = vld [vmem:[#allocation8 + $0x8] sm:$0xff]   ;;  %v1367_v12 = vld [vmem:[#allocation8 + $0x20] sm:$0xff]   ;;  %v1372_v15 = vld [vmem:[#allocation8 + $0x78] sm:$0xff]   ;;  %p1463_p4 = scmp.ne.s32.totalorder %s1051_s9, %s1462_s10  ;;  %p1468_p6 = scmp.lt.s32.totalorder %s1462_s10, %s1462_s10 }
  0x65   :  { %309 = vmatpush1.bf16.msra.mxu1 %v1234_v14  ;;  %792 = vmatprep.subr.bf16.mxu0 %v1277_v34  ;;  %v1368_v13 = vld [vmem:[#allocation8 + $0x68] sm:$0xff]   ;;  %v1313_v34 = vld [vmem:[#allocation7 + $0x110] ss:$8 sps:$4 sm:$0xff]  }
  0x66   :  { %310 = vmatprep.subr.bf16.mxu1 %v1235_v18  ;;  %v1369_v14 = vld [vmem:[#allocation8 + $0x28] sm:$0xff]   ;;  %v1602_v18 = vld [vmem:[%s1639_s2] sm:$0xf]  ;;  %p1469_p7 = por %p1468_p6, %p1467_p5 }
  0x67   :  { %v119_v20 = vrot.slane %v1602_v18, %v118_v17 }
  0x68   :  { %793 = vmatpush1.bf16.msra.mxu0 %v1279_v36  ;;  %v1316_v36 = vld [vmem:[#allocation7 + $0x120] ss:$8 sps:$4 sm:$0xff]   ;;  %p1470_p8 = pnand %p1469_p7, %p1463_p4 }
  0x69   :  { %311 = vmatpush1.bf16.msra.mxu1 %v1237_v21  ;;  %794 = vmatprep.subr.bf16.mxu0 %v1280_v37  ;;  %v123_v21 = vrot.slane %v1602_v18, %v122_v19  ;;  %v1321_v37 = vld [vmem:[#allocation7 + $0x134] ss:$8 sps:$4 sm:$0xff]  }
  0x6a   :  { %337 = vmatprep.subr.bf16.mxu1 %v1240_v22 }
  0x6c   :  { %329 = vmatmul.mubr.bf16.vlgmr.msra.gmra.mrb[0].mxu1 %v1592_v24  ;;  %795 = vmatpush1.bf16.msra.mxu0 %v1282_v40  ;;  %v1322_v40 = vld [vmem:[#allocation7 + $0x140] ss:$8 sps:$4 sm:$0xff]  }
  0x6d   :  { %338 = vmatpush1.bf16.msra.mxu1 %v1238_v26  ;;  %369 = vmatprep.mubr.bf16.mxu1 %v1502_v0  ;;  %v1307_v0 = vld [vmem:[#allocation7 + $0xf4] ss:$8 sps:$4 sm:$0xff]  }
  0x6e   :  { %339 = vmatprep.subr.bf16.mxu1 %v1243_v27  ;;  %796 = vmatprep.subr.bf16.mxu0 %v1283_v41  ;;  %v1327_v41 = vld [vmem:[#allocation7 + $0x154] ss:$8 sps:$4 sm:$0xff]  }
  0x70   :  { %797 = vmatpush1.bf16.msra.mxu0 %v1285_v44  ;;  %v1330_v44 = vld [vmem:[#allocation7 + $0x164] ss:$8 sps:$4 sm:$0xff]  }
  0x71   :  { %340 = vmatpush1.bf16.msra.mxu1 %v1241_v30  ;;  %798 = vmatprep.subr.bf16.mxu0 %v1286_v45  ;;  %v1328_v45 = vld [vmem:[#allocation7 + $0x160] ss:$8 sps:$4 sm:$0xff]  }
  0x72   :  { %341 = vmatprep.subr.bf16.mxu1 %v1246_v31  ;;  %v1310_v31 = vld [vmem:[#allocation7 + $0x100] ss:$8 sps:$4 sm:$0xff]  }
  0x74   :  { %799 = vmatpush1.bf16.msra.mxu0 %v1288_v48 }
  0x75   :  { %342 = vmatpush1.bf16.msra.mxu1 %v1244_v33  ;;  %800 = vmatprep.subr.bf16.mxu0 %v1289_v49  ;;  %v1315_v33 = vld [vmem:[#allocation7 + $0x114] ss:$8 sps:$4 sm:$0xff]  }
  0x76   :  { %343 = vmatprep.subr.bf16.mxu1 %v1249_v35  ;;  %v1318_v35 = vld [vmem:[#allocation7 + $0x124] ss:$8 sps:$4 sm:$0xff]  }
  0x78   :  { %801 = vmatpush1.bf16.msra.mxu0 %v1291_v52 }
  0x79   :  { %344 = vmatpush1.bf16.msra.mxu1 %v1247_v38  ;;  %802 = vmatprep.subr.bf16.mxu0 %v1292_v53  ;;  %v1319_v38 = vld [vmem:[#allocation7 + $0x130] ss:$8 sps:$4 sm:$0xff]   ;;  %v1336_v53 = vld [vmem:[#allocation7 + $0x184] ss:$8 sps:$4 sm:$0xff]  }
  0x7a   :  { %345 = vmatprep.subr.bf16.mxu1 %v1252_v39  ;;  %v1324_v39 = vld [vmem:[#allocation7 + $0x144] ss:$8 sps:$4 sm:$0xff]  }
  0x7c   :  { %803 = vmatpush1.bf16.msra.mxu0 %v1294_v55 }
  0x7d   :  { %346 = vmatpush1.bf16.msra.mxu1 %v1250_v42  ;;  %804 = vmatprep.subr.bf16.mxu0 %v1295_v56  ;;  %v1325_v42 = vld [vmem:[#allocation7 + $0x150] ss:$8 sps:$4 sm:$0xff]   ;;  %v1334_v56 = vld [vmem:[#allocation7 + $0x180] ss:$8 sps:$4 sm:$0xff]  }
  0x7e   :  { %347 = vmatprep.subr.bf16.mxu1 %v1255_v43  ;;  %v130_v43 = vsub.s32 3, %v1596_v16 }
  0x80   :  { %805 = vmatpush1.bf16.msra.mxu0 %v1297_v57 }
  0x81   :  { %348 = vmatpush1.bf16.msra.mxu1 %v1253_v46  ;;  %806 = vmatprep.subr.bf16.mxu0 %v1298_v58  ;;  %v131_v46 = vrot.slane %v1602_v18, %v130_v43  ;;  %v1339_v58 = vld [vmem:[#allocation7 + $0x194] ss:$8 sps:$4 sm:$0xff]  }
  0x82   :  { %349 = vmatprep.subr.bf16.mxu1 %v1258_v47  ;;  %v1333_v47 = vld [vmem:[#allocation7 + $0x174] ss:$8 sps:$4 sm:$0xff]  }
  0x84   :  { %807 = vmatpush1.bf16.msra.mxu0 %v1300_v59  ;;  %v1337_v59 = vld [vmem:[#allocation7 + $0x190] ss:$8 sps:$4 sm:$0xff]  }
  0x85   :  { %350 = vmatpush1.bf16.msra.mxu1 %v1256_v50  ;;  %808 = vmatprep.subr.bf16.mxu0 %v1301_v60  ;;  %v1331_v50 = vld [vmem:[#allocation7 + $0x170] ss:$8 sps:$4 sm:$0xff]   ;;  %v1342_v60 = vld [vmem:[#allocation7 + $0x1a4] ss:$8 sps:$4 sm:$0xff]  }
  0x86   :  { %351 = vmatprep.subr.bf16.mxu1 %v1261_v51 }
  0x88   :  { %809 = vmatpush1.bf16.msra.mxu0 %v1303_v61  ;;  %v1340_v61 = vld [vmem:[#allocation7 + $0x1a0] ss:$8 sps:$4 sm:$0xff]  }
  0x89   :  { %352 = vmatpush1.bf16.msra.mxu1 %v1259_v54  ;;  %810 = vmatprep.subr.bf16.mxu0 %v1304_v62  ;;  %v1345_v62 = vld [vmem:[#allocation7 + $0x1b4] ss:$8 sps:$4 sm:$0xff]  }
  0x8a   :  { %1174 = vmatprep.subr.bf16.mxu1 %v1358_v3  ;;  %v1351_v3 = vld [vmem:[#allocation7 + $0x1d4] ss:$8 sps:$4 sm:$0xff]  }
  0x8c   :  { %370 = vmatmul.mubr.bf16.vlgmr.msra.gmra.mrb[4].mxu1 %v1592_v24  ;;  %811 = vmatpush1.bf16.msra.mxu0 %v1306_v63  ;;  %v1343_v63 = vld [vmem:[#allocation7 + $0x1b0] ss:$8 sps:$4 sm:$0xff]  }
  0x8d   :  { %812 = vmatprep.subr.bf16.mxu0 %v1307_v0  ;;  %1175 = vmatpush3.bf16.msra.mxu1 %v1359_v4  ;;  %v1348_v0 = vld [vmem:[#allocation7 + $0x1c4] ss:$8 sps:$4 sm:$0xff]   ;;  %v1349_v4 = vld [vmem:[#allocation7 + $0x1d0] ss:$8 sps:$4 sm:$0xff]  }
  0x8e   :  { %1176 = vmatprep.subr.bf16.mxu1 %v1360_v5 }
  0x90   :  { %813 = vmatpush1.bf16.msra.mxu0 %v1309_v1  ;;  %v1346_v1 = vld [vmem:[#allocation7 + $0x1c0] ss:$8 sps:$4 sm:$0xff]  }
  0x91   :  { %823 = vmatprep.subr.bf16.mxu0 %v1312_v2  ;;  %1177 = vmatpush3.bf16.msra.mxu1 %v1361_v6  ;;  %v126_v2 = vsub.s32 2, %v1596_v16  ;;  %v1354_v6 = vld [vmem:[#allocation7 + $0x1e4] ss:$8 sps:$4 sm:$0xff]  }
  0x92   :  { %1178 = vmatprep.subr.bf16.mxu1 %v1362_v7  ;;  %v1352_v7 = vld [vmem:[#allocation7 + $0x1e0] ss:$8 sps:$4 sm:$0xff]  }
  0x93   :  { %v127_v5 = vrot.slane %v1602_v18, %v126_v2  ;;  %v1373_v18 = vld [vmem:[#allocation8 + $0x38] sm:$0xff]  }
  0x95   :  { %1179 = vmatpush3.bf16.msra.mxu1 %v1363_v8 }
  0x96   :  { %1180 = vmatprep.subr.bf16.mxu1 %v1364_v9  ;;  %v1357_v9 = vld [vmem:[#allocation7 + $0x1f4] ss:$8 sps:$4 sm:$0xff]  }
  0x99   :  { %1181 = vmatpush3.bf16.msra.mxu1 %v1365_v10  ;;  %v1355_v10 = vld [vmem:[#allocation7 + $0x1f0] ss:$8 sps:$4 sm:$0xff]  }
  0x9a   :  { %1182 = vmatprep.subr.bf16.mxu1 %v1366_v11 }
  0x9d   :  { %1183 = vmatpush3.bf16.msra.mxu1 %v1367_v12 }
  0x9e   :  { %1184 = vmatprep.subr.bf16.mxu1 %v1368_v13  ;;  %v1370_v13 = vld [vmem:[#allocation8 + $0x70] sm:$0xff]  }
  0xa1   :  { %1185 = vmatpush3.bf16.msra.mxu1 %v1369_v14  ;;  %v1371_v14 = vld [vmem:[#allocation8 + $0x30] sm:$0xff]  }
  0xa2   :  { %1186 = vmatprep.subr.bf16.mxu1 %v1370_v13 }
  0xa5   :  { %1187 = vmatpush3.bf16.msra.mxu1 %v1371_v14 }
  0xa6   :  { %1188 = vmatprep.subr.bf16.mxu1 %v1372_v15 }
  0xa9   :  { %1189 = vmatpush3.bf16.msra.mxu1 %v1373_v18 }
 0x13f   :  { %v330_v22 = vpop.f32.mrb[0].mxu1 }
 0x140   :  { %v331_v23 = vadd.f32 %v330_v22, %v119_v20  ;;  %v332_v24 = vpop.f32.mrb[1].mxu1  ;;  %v450_v20 = vld [vmem:[%s1641_s4] sm:$0x3] }
 0x141   :  { %v333_v25 = vadd.f32 %v332_v24, %v123_v21  ;;  %v334_v26 = vpop.f32.mrb[2].mxu1  ;;  %v455_v21 = vrot.slane %v450_v20, %v118_v17  ;;  %v459_v22 = vrot.slane %v450_v20, %v122_v19  ;;  %v1157_v17 = vld [vmem:[%s1643_s6] ss:$0 sm:$0xff] }
 0x142   :  { %v378_v27 = vmax.f32 %v331_v23, 0.0  ;;  %v335_v28 = vpop.f32.mrb[3].mxu1 }
 0x143   :  { %v379_v29 = vmax.f32 %v333_v25, 0.0 }
 0x144   :  { %v382_v32 = vpack.c.bf16 %v378_v27, %v378_v27 }
 0x145   :  { %v383_v30 = vpack.c.bf16 %v379_v29, %v379_v29 }
 0x147   :  { %814 = vmatprep.mubr.bf16.mxu0 %v383_v30 }
 0x148   :  { %815 = vmatmul.mubr.bf16.vlgmr.msra.gmra.mrb[0].mxu0 %v382_v32 }
 0x149   :  { %824 = vmatpush1.bf16.msra.mxu0 %v1310_v31 }
 0x14a   :  { %825 = vmatprep.subr.bf16.mxu0 %v1315_v33 }
 0x14d   :  { %826 = vmatpush1.bf16.msra.mxu0 %v1313_v34 }
 0x14e   :  { %827 = vmatprep.subr.bf16.mxu0 %v1318_v35 }
 0x151   :  { %828 = vmatpush1.bf16.msra.mxu0 %v1316_v36 }
 0x152   :  { %829 = vmatprep.subr.bf16.mxu0 %v1321_v37 }
 0x155   :  { %830 = vmatpush1.bf16.msra.mxu0 %v1319_v38 }
 0x156   :  { %831 = vmatprep.subr.bf16.mxu0 %v1324_v39 }
 0x159   :  { %832 = vmatpush1.bf16.msra.mxu0 %v1322_v40 }
 0x15a   :  { %833 = vmatprep.subr.bf16.mxu0 %v1327_v41 }
 0x15d   :  { %834 = vmatpush1.bf16.msra.mxu0 %v1325_v42 }
 0x15e   :  { %835 = vmatprep.subr.bf16.mxu0 %v1330_v44 }
 0x15f   :  { %v371_v48 = vpop.f32.mrb[4].mxu1 }
 0x160   :  { %v373_v49 = vpop.f32.mrb[5].mxu1  ;;  %v372_v8 = vadd.f32 %v371_v48, %v127_v5 }
 0x161   :  { %836 = vmatpush1.bf16.msra.mxu0 %v1328_v45  ;;  %v374_v51 = vadd.f32 %v373_v49, %v131_v46  ;;  %v375_v52 = vpop.f32.mrb[6].mxu1 }
 0x162   :  { %837 = vmatprep.subr.bf16.mxu0 %v1333_v47  ;;  %v376_v54 = vpop.f32.mrb[7].mxu1  ;;  %v380_v11 = vmax.f32 %v372_v8, 0.0 }
 0x163   :  { %v381_v55 = vmax.f32 %v374_v51, 0.0 }
 0x164   :  { %v384_v12 = vpack.c.bf16 %v380_v11, %v380_v11 }
 0x165   :  { %838 = vmatpush1.bf16.msra.mxu0 %v1331_v50  ;;  %v385_v57 = vpack.c.bf16 %v381_v55, %v381_v55 }
 0x166   :  { %839 = vmatprep.subr.bf16.mxu0 %v1336_v53 }
 0x167   :  { %855 = vmatprep.mubr.bf16.mxu0 %v385_v57 }
 0x169   :  { %840 = vmatpush1.bf16.msra.mxu0 %v1334_v56 }
 0x16a   :  { %841 = vmatprep.subr.bf16.mxu0 %v1339_v58 }
 0x16d   :  { %842 = vmatpush1.bf16.msra.mxu0 %v1337_v59 }
 0x16e   :  { %843 = vmatprep.subr.bf16.mxu0 %v1342_v60 }
 0x171   :  { %844 = vmatpush1.bf16.msra.mxu0 %v1340_v61 }
 0x172   :  { %845 = vmatprep.subr.bf16.mxu0 %v1345_v62 }
 0x175   :  { %846 = vmatpush1.bf16.msra.mxu0 %v1343_v63 }
 0x176   :  { %847 = vmatprep.subr.bf16.mxu0 %v1348_v0 }
 0x179   :  { %848 = vmatpush1.bf16.msra.mxu0 %v1346_v1 }
 0x17a   :  { %849 = vmatprep.subr.bf16.mxu0 %v1351_v3 }
 0x17d   :  { %850 = vmatpush1.bf16.msra.mxu0 %v1349_v4 }
 0x17e   :  { %851 = vmatprep.subr.bf16.mxu0 %v1354_v6 }
 0x181   :  { %852 = vmatpush1.bf16.msra.mxu0 %v1352_v7 }
 0x182   :  { %853 = vmatprep.subr.bf16.mxu0 %v1357_v9 }
 0x185   :  { %854 = vmatpush1.bf16.msra.mxu0 %v1355_v10 }
 0x188   :  { %856 = vmatmul.mubr.bf16.vlgmr.msra.gmra.mrb[0].mxu0 %v384_v12 }
 0x25b   :  { %v857_v23 = vpop.f32.mrb[0].mxu0 }
 0x25c   :  { %v1196_v24 = vadd.f32 %v857_v23, %v455_v21  ;;  %v859_v25 = vpop.f32.mrb[1].mxu0 }
 0x25d   :  { %v1197_v26 = vadd.f32 %v859_v25, %v459_v22  ;;  %v861_v27 = vpop.f32.mrb[2].mxu0 }
 0x25e   :  { %v864_v28 = vmax.f32 %v1196_v24, 0.0  ;;  %v862_v29 = vpop.f32.mrb[3].mxu0 }
 0x25f   :  { %v865_v30 = vmax.f32 %v1197_v26, 0.0 }
 0x260   :  { %v866_v32 = vpack.c.bf16 %v864_v28, %v864_v28 }
 0x261   :  { %v867_v31 = vpack.c.bf16 %v865_v30, %v865_v30 }
 0x263   :  { %1035 = vmatprep.mubr.bf16.mxu1 %v867_v31 }
 0x264   :  { %1036 = vmatmul.mubr.bf16.vlgmr.msra.gmra.mrb[8].mxu1 %v866_v32 }
 0x337   :  { %v1190_v33 = vpop.f32.mrb[8].mxu1 }
 0x338   :  { %v1191_v34 = vpop.f32.mrb[9].mxu1 }
 0x339   :  { %v1192_v16 = vadd.f32 %v1191_v34, %v1190_v33  ;;  %v1193_v19 = vpop.f32.mrb[10].mxu1 }
 0x33a   :  { %v1194_v35 = vpop.f32.mrb[11].mxu1 }
 0x33b   :  { %v1038_v36 = vadd.f32 %v1192_v16, %v1157_v17 }
 0x33d   :  { %1043 = vst [vmem:[#allocation10] sm:$0xf] %v1038_v36 }
 0x33e   :  { %1473 = shalt.err (!%p1470_p8)
}
 0x33f   :  { %s1474_s6 = scalar_lea.hbm %s1644_s7, 64 }
 0x340   :  { %p1475_p9 = scmp.ne.s32.totalorder %s1644_s7, %s1474_s6  ;;  %p1478_p10 = scmp.lt.u32.totalorder %s1474_s6, %s1644_s7 }
 0x342   :  { %p1480_p11 = pnand %p1478_p10, %p1475_p9 }
 0x344   :  { %1483 = shalt.err (!%p1480_p11)
}
 0x345   :  { %1053 = dma.vmem_to_hbm [thread:$0]  %s1051_s9, 64, %s1644_s7, [#allocation4]  }
 0x346   :  { %1490 = dma.done.wait [#allocation4], 64  }
 0x347   :  { %1491 = vsyncadd [#allocation4], 4294967232 }
 0x348   :  { %1057 = vsyncpa [#allocation3], 1 }
 0x349   :  { %1058 = vsyncpa [#allocation6], 1 }
 0x34a   :  { %1059 = vsyncpa [#allocation9], 1 }
 0x34b   :  { %1060 = vsyncpa [#allocation4], 1 }

</bundles_post_ra>
